<compile_context>
chip_gen: v5e
topology: v5e:2x2
jax: 0.10.0
libtpu: 0.0.40
codegen_flags: <defaults>
</compile_context>

<pallas_src>
import functools

import jax
import jax.numpy as jnp
from jax.experimental import pallas as pl
from jax.experimental.pallas import tpu as pltpu


# ----------------------------- Pallas kernel ------------------------------ #
def _conv_tile_kernel(x_ref, halo_ref, w_ref, b_ref, out_ref, hsum_ref, *, L, TL):
    """One (batch b, row-tile j) grid step of the 'same' Conv1d + partial sequence sum.

    x_ref:    (1, TL, E)          bf16  rows [j*TL, (j+1)*TL) of the padded input
    halo_ref: (1, 1, K-1, E)      bf16  the K-1 padded rows following the tile
    w_ref:    (K*E, H)            bf16  conv taps folded into the contraction dim
    b_ref:    (1, H)              f32   bias
    out_ref:  (TL, H) or (1, TL, H) f32 conv output block for (b, tile j)
    hsum_ref: (1, 1, 1, H)        f32   partial sum over the *valid* rows of this tile
    """
    K = halo_ref.shape[2] + 1

    xs = jnp.concatenate([x_ref[0], halo_ref[0, 0]], axis=0)              # (TL+K-1, E)
    # im2col in VMEM: cols[:, t*E:(t+1)*E] = xs[t : t+TL]  -> ONE MXU contraction.
    cols = jnp.concatenate([xs[t:t + TL] for t in range(K)], axis=1)      # (TL, K*E)
    acc = jnp.dot(cols, w_ref[...], preferred_element_type=jnp.float32)   # (TL, H) f32
    acc = acc + b_ref[...]
    out_ref[...] = acc.reshape(out_ref.shape)                             # full-block store

    # Partial h_n: exclude rows beyond the true sequence length (tail-padded last tile).
    j = pl.program_id(1)
    valid = jnp.minimum(TL, L - j * TL)
    rows = jax.lax.broadcasted_iota(jnp.int32, (TL, 1), 0)
    masked = jnp.where(rows < valid, acc, 0.0)
    hsum_ref[0, 0] = jnp.sum(masked, axis=0, keepdims=True)               # (1, H)


# ------------------------------ Helpers ----------------------------------- #
def _round_up(x, m):
    return ((x + m - 1) // m) * m


def _pick_tile_l(L, target=512):
    """8-aligned row tile <= ~target; L gets padded up to a multiple of it (tail masked)."""
    t_est = -(-L // target)                 # number of tiles if each were <= target
    return _round_up(-(-L // t_est), 8)


def _vmem_limit_bytes(TL, E, H, K):
    """Per-step block math (double-buffered) with headroom; safe on v5e/v6e/v7x."""
    x_blk = TL * E * 2
    halo_blk = (K - 1) * E * 2
    w_blk = K * E * H * 2
    b_blk = H * 4
    out_blk = TL * H * 4
    hs_blk = H * 4
    est = 2 * (x_blk + halo_blk + w_blk + b_blk + out_blk + hs_blk)
    return int(min(64 * 1024 * 1024, max(32 * 1024 * 1024, 2 * est)))


# --------------------------- pallas_call wrapper --------------------------- #
def conv1d_encoder_pallas(x_main, halo, w2, bias2, *, L, TL):
    """x_main: (B, Lt, E) bf16 padded rows; halo: (B, T, K-1, E) bf16; w2: (K*E, H) bf16;
    bias2: (1, H) f32.  Returns (conv_out, hsum, lane_dense):
      lane_dense=True  -> conv_out is (Lt, B*H)  (== (L, B, H) row-major after slicing)
      lane_dense=False -> conv_out is (B, Lt, H) (wrapper transposes)
      hsum is (B, T, 1, H) per-tile partial sums over valid rows."""
    B, Lt, E = x_main.shape
    T, Km1 = halo.shape[1], halo.shape[2]
    K = Km1 + 1
    KE, H = w2.shape
    assert KE == K * E and Lt == T * TL

    lane_dense = (H % 128 == 0)
    if lane_dense:
        # Write straight into the permuted (L, B*H) layout: unmasked lane-dense stores,
        # no wrapper transpose pass.
        out_shape0 = jax.ShapeDtypeStruct((Lt, B * H), jnp.float32)
        out_spec0 = pl.BlockSpec((TL, H), lambda b, j: (j, b))
    else:
        # H not 128-aligned: keep full-H blocks in (B, Lt, H) order (always legal) and
        # transpose in the wrapper.
        out_shape0 = jax.ShapeDtypeStruct((B, Lt, H), jnp.float32)
        out_spec0 = pl.BlockSpec((1, TL, H), lambda b, j: (b, j, 0))

    kernel = functools.partial(_conv_tile_kernel, L=L, TL=TL)
    out0, hsum = pl.pallas_call(
        kernel,
        out_shape=(out_shape0, jax.ShapeDtypeStruct((B, T, 1, H), jnp.float32)),
        grid=(B, T),
        in_specs=[
            pl.BlockSpec((1, TL, E), lambda b, j: (b, j, 0)),
            pl.BlockSpec((1, 1, Km1, E), lambda b, j: (b, j, 0, 0)),
            # Constant-index folded weight / bias: DMA'd once, stays VMEM-resident.
            pl.BlockSpec((KE, H), lambda b, j: (0, 0)),
            pl.BlockSpec((1, H), lambda b, j: (0, 0)),
        ],
        out_specs=(
            out_spec0,
            pl.BlockSpec((1, 1, 1, H), lambda b, j: (b, j, 0, 0)),
        ),
        compiler_params=pltpu.CompilerParams(
            # No cross-step state on either axis -> both megacore-splittable.
            dimension_semantics=("parallel", "parallel"),
            vmem_limit_bytes=_vmem_limit_bytes(TL, E, H, K),
        ),
    )(x_main, halo, w2, bias2)
    return out0, hsum, lane_dense


# --------------------------- Encoder wrapper ------------------------------- #
def convolutional_encoder_forward(seq_word_indexes, params,
                                  model_type="lstm", attention=True, seqlen=None):
    """seq_word_indexes: (B, L) int32 token ids. Mirrors ConvolutionalEncoder.forward."""
    del seqlen  # unused by the reference forward
    emb = params["word_embeddings"]          # (V, E) f32 embedding table
    w_pt = params["conv_weight"]             # (H, E, K) -- PyTorch Conv1d layout
    bias = params["conv_bias"]               # (H,)
    V, E = emb.shape
    H, _, K = w_pt.shape
    assert K % 2 == 1, "reference module only supports odd kernel sizes (3/5/7)"
    pad = K // 2
    B, L = seq_word_indexes.shape

    TL = _pick_tile_l(L)
    Lt = _round_up(L, TL)
    T = Lt // TL

    # bf16 table + appended zero row; ONE gather with padded ids produces the padded
    # bf16 activation slab directly ('same' zero padding + ragged tail fused in).
    emb_ext = jnp.concatenate(
        [emb.astype(jnp.bfloat16), jnp.zeros((1, E), jnp.bfloat16)], axis=0)   # row V == 0
    n_tail = Lt + TL - L - pad
    idx_dtype = seq_word_indexes.dtype
    idx_ext = jnp.concatenate(
        [jnp.full((B, pad), V, idx_dtype), seq_word_indexes,
         jnp.full((B, n_tail), V, idx_dtype)], axis=1)                         # (B, Lt+TL)
    x_main = emb_ext[idx_ext[:, :Lt]]                                          # (B, Lt, E) bf16
    # drop_in / drop_out: identity (eval mode).

    # Halo = the K-1 padded rows following each tile: reshape/slice the tiny id array,
    # then a tiny gather (keeps main input DMA at 1x, no big-slab gather).
    halo_ids = idx_ext[:, TL:].reshape(B, T, TL)[:, :, :K - 1]                 # (B, T, K-1)
    halo = emb_ext[halo_ids]                                                   # (B, T, K-1, E)

    # Fold the K taps into the contraction dim: w2[t*E + e, h] = w_pt[h, e, t].
    w2 = jnp.transpose(w_pt, (2, 1, 0)).reshape(K * E, H).astype(jnp.bfloat16)
    bias2 = bias.reshape(1, H).astype(jnp.float32)

    out0, hsum, lane_dense = conv1d_encoder_pallas(x_main, halo, w2, bias2, L=L, TL=TL)

    # NOTE: self.hidden_conv(x) in the reference is computed but never used (its result
    # is not assigned), so it is intentionally omitted here.
    if lane_dense:
        out = out0[:L].reshape(L, B, H)                    # free reshape, already permuted
    else:
        out = jnp.transpose(out0[:, :L, :], (1, 0, 2))     # (L, B, H)
    h_n = jnp.sum(hsum[:, :, 0, :], axis=1)                # (B, H): reduce tiny partials

    if model_type == "lstm":
        c_n = h_n
        if attention:
            return out, (h_n, c_n)
        return h_n, (h_n, c_n)
    if attention:
        return out, h_n
    return h_n, h_n


# ------------------------------- Main -------------------------------------- #
if __name__ == "__main__":
    # Small, deterministic configuration (L=9 exercises the ragged/masked-tail path).
    B, L = 2, 9                   # batch, sequence length
    V, E, H, K = 20, 32, 32, 3    # vocab, word_embdim, hidden_size, kernel_size

    key = jax.random.PRNGKey(0)
    k_emb, k_w, k_b, k_idx = jax.random.split(key, 4)

    params = {
        "word_embeddings": jax.random.normal(k_emb, (V, E), jnp.float32) * 0.1,
        "conv_weight": jax.random.normal(k_w, (H, E, K), jnp.float32) * 0.1,
        "conv_bias": jax.random.normal(k_b, (H,), jnp.float32) * 0.1,
    }
    seq_word_indexes = jax.random.randint(k_idx, (B, L), 0, V, jnp.int32)

    out, (h_n, c_n) = convolutional_encoder_forward(
        seq_word_indexes, params, model_type="lstm", attention=True
    )
    jax.block_until_ready((out, h_n, c_n))

    # Independent reference with lax.conv (NCH layout, like PyTorch Conv1d), evaluated on
    # the same bf16-rounded operands the kernel consumes (kernel accumulates in f32).
    emb_rt = params["word_embeddings"].astype(jnp.bfloat16).astype(jnp.float32)
    w_rt = params["conv_weight"].astype(jnp.bfloat16).astype(jnp.float32)
    x_bel = jnp.transpose(emb_rt[seq_word_indexes], (0, 2, 1))          # (B, E, L)
    ref_x = jax.lax.conv_general_dilated(
        x_bel, w_rt, window_strides=(1,), padding=[(K // 2, K // 2)],
        dimension_numbers=("NCH", "OIH", "NCH"),
    ) + params["conv_bias"][None, :, None]                              # (B, H, L)
    ref_out = jnp.transpose(ref_x, (2, 0, 1))                           # (L, B, H)
    ref_h = ref_x.sum(axis=2)                                           # (B, H)

    assert out.shape == (L, B, H) and h_n.shape == (B, H) and c_n.shape == (B, H)
    assert jnp.allclose(out, ref_out, atol=1e-2, rtol=1e-2)
    assert jnp.allclose(h_n, ref_h, atol=1e-2, rtol=1e-2)
    assert jnp.allclose(c_n, h_n)

    print("KERNEL_OK")
</pallas_src>

<mosaic_0001>
module attributes {stable_mosaic.version = 11 : i64} {
  func.func @_conv_tile_kernel(%arg0: i32, %arg1: i32, %arg2: memref<1x16x32xbf16, #tpu.memory_space<vmem>>, %arg3: memref<1x1x2x32xbf16, #tpu.memory_space<vmem>>, %arg4: memref<96x32xbf16, #tpu.memory_space<vmem>>, %arg5: memref<1x32xf32, #tpu.memory_space<vmem>>, %arg6: memref<1x16x32xf32, #tpu.memory_space<vmem>>, %arg7: memref<1x1x1x32xf32, #tpu.memory_space<vmem>>) attributes {dimension_semantics = [#tpu.dimension_semantics<parallel>, #tpu.dimension_semantics<parallel>], iteration_bounds = array<i64: 2, 1>, scalar_prefetch = 0 : i64, scratch_operands = 0 : i64, tpu.core_type = #tpu.core_type<tc>, window_params = [{transform_indices = @transform_0, window_bounds = array<i64: 1, 16, 32>}, {transform_indices = @transform_1, window_bounds = array<i64: 1, 1, 2, 32>}, {pipeline_mode = #tpu.pipeline_mode<synchronous>, transform_indices = @transform_2, window_bounds = array<i64: 96, 32>}, {pipeline_mode = #tpu.pipeline_mode<synchronous>, transform_indices = @transform_3, window_bounds = array<i64: 1, 32>}, {transform_indices = @transform_4, window_bounds = array<i64: 1, 16, 32>}, {transform_indices = @transform_5, window_bounds = array<i64: 1, 1, 1, 32>}]} {
    %c0 = arith.constant 0 : index
    %c0_0 = arith.constant 0 : index
    %c0_1 = arith.constant 0 : index
    %0 = vector.load %arg2[%c0, %c0_0, %c0_1] : memref<1x16x32xbf16, #tpu.memory_space<vmem>>, vector<1x16x32xbf16>
    %1 = vector.shape_cast %0 : vector<1x16x32xbf16> to vector<16x32xbf16>
    %c0_2 = arith.constant 0 : index
    %c0_3 = arith.constant 0 : index
    %c0_4 = arith.constant 0 : index
    %c0_5 = arith.constant 0 : index
    %2 = vector.load %arg3[%c0_2, %c0_3, %c0_4, %c0_5] : memref<1x1x2x32xbf16, #tpu.memory_space<vmem>>, vector<1x1x2x32xbf16>
    %3 = vector.shape_cast %2 : vector<1x1x2x32xbf16> to vector<2x32xbf16>
    %4 = tpu.concatenate %1, %3 in 0 : vector<16x32xbf16>, vector<2x32xbf16> -> vector<18x32xbf16>
    %5 = vector.extract_strided_slice %4 {offsets = [0, 0], sizes = [16, 32], strides = [1, 1]} : vector<18x32xbf16> to vector<16x32xbf16>
    %6 = vector.extract_strided_slice %4 {offsets = [1, 0], sizes = [16, 32], strides = [1, 1]} : vector<18x32xbf16> to vector<16x32xbf16>
    %7 = vector.extract_strided_slice %4 {offsets = [2, 0], sizes = [16, 32], strides = [1, 1]} : vector<18x32xbf16> to vector<16x32xbf16>
    %8 = tpu.concatenate %5, %6, %7 in 1 : vector<16x32xbf16>, vector<16x32xbf16>, vector<16x32xbf16> -> vector<16x96xbf16>
    %c0_6 = arith.constant 0 : index
    %c0_7 = arith.constant 0 : index
    %9 = vector.load %arg4[%c0_6, %c0_7] : memref<96x32xbf16, #tpu.memory_space<vmem>>, vector<96x32xbf16>
    %cst = arith.constant dense<0.000000e+00> : vector<16x32xf32>
    %10 = tpu.matmul %8, %9, %cst {dimension_numbers = #tpu.dot_dimension_numbers<[1], [0], [0], [1], [0, 0, 1, 1], [], []>} : vector<16x96xbf16>, vector<96x32xbf16>, vector<16x32xf32> -> vector<16x32xf32>
    %c0_8 = arith.constant 0 : index
    %c0_9 = arith.constant 0 : index
    %11 = vector.load %arg5[%c0_8, %c0_9] : memref<1x32xf32, #tpu.memory_space<vmem>>, vector<1x32xf32>
    %12 = vector.broadcast %11 : vector<1x32xf32> to vector<16x32xf32>
    %13 = arith.addf %10, %12 : vector<16x32xf32>
    %14 = vector.shape_cast %13 : vector<16x32xf32> to vector<1x16x32xf32>
    %c0_10 = arith.constant 0 : index
    %c0_11 = arith.constant 0 : index
    %c0_12 = arith.constant 0 : index
    %15 = vector.load %arg6[%c0_10, %c0_11, %c0_12] : memref<1x16x32xf32, #tpu.memory_space<vmem>>, vector<1x16x32xf32>
    tpu.vector_store %arg6[%c0_10, %c0_11, %c0_12], %14 {strides = array<i32>} : memref<1x16x32xf32, #tpu.memory_space<vmem>>, vector<1x16x32xf32>,
    %c16_i32 = arith.constant 16 : i32
    %16 = arith.muli %arg1, %c16_i32 : i32
    %c9_i32 = arith.constant 9 : i32
    %17 = arith.subi %c9_i32, %16 : i32
    %c16_i32_13 = arith.constant 16 : i32
    %18 = arith.minsi %c16_i32_13, %17 : i32
    %19 = tpu.iota {dimensions = array<i32: 0>} : vector<16x1xi32>
    %20 = vector.broadcast %18 : i32 to vector<16x1xi32>
    %21 = arith.cmpi slt, %19, %20 : vector<16x1xi32>
    %cst_14 = arith.constant 0.000000e+00 : f32
    %22 = vector.shape_cast %21 : vector<16x1xi1> to vector<16x1xi1>
    %23 = vector.broadcast %22 : vector<16x1xi1> to vector<16x32xi1>
    %24 = vector.broadcast %cst_14 : f32 to vector<16x32xf32>
    %25 = arith.select %23, %13, %24 : vector<16x32xi1>, vector<16x32xf32>
    %cst_15 = arith.constant dense<0.000000e+00> : vector<32xf32>
    %26 = vector.multi_reduction <add>, %25, %cst_15 [0] : vector<16x32xf32> to vector<32xf32>
    %27 = vector.shape_cast %26 : vector<32xf32> to vector<1x32xf32>
    %c0_16 = arith.constant 0 : index
    %c0_17 = arith.constant 0 : index
    %c0_18 = arith.constant 0 : index
    %c0_19 = arith.constant 0 : index
    %28 = vector.load %arg7[%c0_16, %c0_17, %c0_18, %c0_19] : memref<1x1x1x32xf32, #tpu.memory_space<vmem>>, vector<1x1x1x32xf32>
    %29 = vector.shape_cast %28 : vector<1x1x1x32xf32> to vector<1x32xf32>
    %30 = vector.shape_cast %27 : vector<1x32xf32> to vector<1x1x1x32xf32>
    tpu.vector_store %arg7[%c0_16, %c0_17, %c0_18, %c0_19], %30 {strides = array<i32>} : memref<1x1x1x32xf32, #tpu.memory_space<vmem>>, vector<1x1x1x32xf32>,
    return
  }
  func.func @transform_0(%arg0: i32, %arg1: i32) -> (i32, i32, i32) {
    %c0_i32 = arith.constant 0 : i32
    %c0_i32_0 = arith.constant 0 : i32
    return %arg0, %arg1, %c0_i32 : i32, i32, i32
  }
  func.func @transform_1(%arg0: i32, %arg1: i32) -> (i32, i32, i32, i32) {
    %c0_i32 = arith.constant 0 : i32
    %c0_i32_0 = arith.constant 0 : i32
    %c0_i32_1 = arith.constant 0 : i32
    return %arg0, %arg1, %c0_i32, %c0_i32_0 : i32, i32, i32, i32
  }
  func.func @transform_2(%arg0: i32, %arg1: i32) -> (i32, i32) {
    %c0_i32 = arith.constant 0 : i32
    %c0_i32_0 = arith.constant 0 : i32
    %c0_i32_1 = arith.constant 0 : i32
    return %c0_i32, %c0_i32_0 : i32, i32
  }
  func.func @transform_3(%arg0: i32, %arg1: i32) -> (i32, i32) {
    %c0_i32 = arith.constant 0 : i32
    %c0_i32_0 = arith.constant 0 : i32
    %c0_i32_1 = arith.constant 0 : i32
    return %c0_i32, %c0_i32_0 : i32, i32
  }
  func.func @transform_4(%arg0: i32, %arg1: i32) -> (i32, i32, i32) {
    %c0_i32 = arith.constant 0 : i32
    %c0_i32_0 = arith.constant 0 : i32
    return %arg0, %arg1, %c0_i32 : i32, i32, i32
  }
  func.func @transform_5(%arg0: i32, %arg1: i32) -> (i32, i32, i32, i32) {
    %c0_i32 = arith.constant 0 : i32
    %c0_i32_0 = arith.constant 0 : i32
    %c0_i32_1 = arith.constant 0 : i32
    return %arg0, %arg1, %c0_i32, %c0_i32_0 : i32, i32, i32, i32
  }
}

</mosaic_0001>

<bundles_post_ra>
// kernel: tpu_custom_call.1
= control target key start
LH: loop header
LB: loop body
LE: loop exit
PB: predicated region body
PF: predicated region fallthrough
CT: control target
= control target key end

     0   :  { %11 = vsyncpa [#allocation3], 0  ;;  %s990_s0 = inlined_call_operand.vmem [shape: bf16[2,16,32], index: 0, kind: input, shape index: {}]   ;;  %s991_s1 = inlined_call_operand.vmem [shape: bf16[2,1,2,32], index: 1, kind: input, shape index: {}]   ;;  %s992_s2 = inlined_call_operand.vmem [shape: bf16[96,32], index: 2, kind: input, shape index: {}]   ;;  %s993_s3 = inlined_call_operand.vmem [shape: f32[1,32], index: 3, kind: input, shape index: {}]   ;;  %s994_s4 = inlined_call_operand.hbm [shape: f32[2,16,32], index: 4, kind: output, shape index: {0}]   ;;  %s995_s5 = inlined_call_operand.hbm [shape: f32[2,1,1,32], index: 5, kind: output, shape index: {1}]  }
   0x1   :  { %13 = vsyncpa [#allocation3 + $0x1], 0 }
   0x2   :  { %14 = vsyncpa [#allocation5], 0 }
   0x3   :  { %16 = vsyncpa [#allocation5 + $0x1], 0  ;;  %s844_s18 = smov 0   ;;  %s846_s19 = smov 0  }
   0x4   :  { %s848_s20 = smov 0   ;;  %s850_s21 = smov 0  }
   0x5   :  { %s852_s22 = smov 0   ;;  %s854_s23 = smov 0  }
   0x6 LB: > { %s582_s24 = sadd.s32 4294967295, %s808_s23   ;;  %s583_s25 = sadd.s32 4294967294, %s808_s23   ;;  %s808_s23 = sphi %s854_s23, %s22_s23   ;;  %s804_s22 = sphi %s852_s22, %s1002_s22   ;;  %s800_s21 = sphi %s850_s21, %s1001_s21   ;;  %s796_s20 = sphi %s848_s20, %s1000_s20   ;;  %s792_s19 = sphi %s846_s19, %s999_s19   ;;  %s788_s18 = sphi %s844_s18, %s998_s18  }
   0x7   : > { %s34_s26 = sadd.s32 1, %s804_s22  ;;  %s141_s27 = sadd.s32 1, %s796_s20 }
   0x8   : > { %p36_p0 = scmp.ge.s32.totalorder %s34_s26, 2  ;;  %p151_p1 = scmp.ne.s32.totalorder %s796_s20, %s792_s19 }
   0x9   : > { %p152_p2 = scmp.eq.s32.totalorder %s582_s24, 1  ;;  %p157_p3 = scmp.ne.s32.totalorder %s792_s19, %s788_s18 }
   0xa   : > { %s1004_s26 = smov (%p36_p0, %s34_s26), 0  ;;  %p158_p5 = scmp.eq.s32.totalorder %s583_s25, 1 }
   0xb   : > { %p884_p4 = por %p152_p2, %p151_p1  ;;  %s136_s29 = ssub.s32 %s804_s22, %s1004_s26 }
   0xc   : > { %p586_p6 = scmp.ge.s32.totalorder %s808_s23, 1  ;;  %p139_p7 = scmp.eq.s32.totalorder %s136_s29, 0 }
   0xd   : > { %p891_p8 = por %p158_p5, %p157_p3  ;;  %p232_p9 = scmp.lt.s32.totalorder %s808_s23, 3 }
   0xe   : > { %s897_s6 = scalar_select %p139_p7, %s796_s20, %s141_s27  }
   0xf   : > { %p233_p10 = pnand %p586_p6, %p232_p9 }
  0x10   : > { %p275_p11 = scmp.lt.s32.totalorder (!%p233_p10), %s800_s21, 1  ;;  %s810_s8 = smov (!%p233_p10), 32  }
  0x11   : > { %236 = sbr.rel (%p233_p10) target bundleno = 314 (0x13a), region = 36  ;;  %s927_s14 = sand.u32 (!%p233_p10), 1, %s792_s19  }
  0x12   : > { %s427_s10 = scalar_lea.sflag (!%p233_p10), [#allocation3], %s927_s14  ;;  %s718_s16 = scalar_lea.hbm (!%p233_p10), %s994_s4, 32 }
  0x16   : > { %v631_v0 = vld [vmem:[%s992_s2 + $0x28] sm:$0xff]  ;;  %s276_s9 = scalar_select %p275_p11, %s800_s21, 1  ;;  %v630_v1 = vld [vmem:[%s992_s2 + $0x20] sm:$0xff]  ;;  %v629_v5 = vld [vmem:[%s992_s2 + $0x18] sm:$0xff]  ;;  %vm300_vm0 = vsmask.f32 7424  ;;  %v403_v22 = vlaneseq }
  0x17   : > { %385 = vmatpush.bf16.msra.mxu0 %v631_v0  ;;  %v628_v10 = vld [vmem:[%s992_s2 + $0x10] sm:$0xff]  ;;  %vm316_vm1 = vcmask 1046528   ;;  %v627_v16 = vld [vmem:[%s992_s2 + $0x8] sm:$0xff]  ;;  %v626_v17 = vld [vmem:[%s992_s2] sm:$0xff]  ;;  %vm322_vm2 = vcmask 261120   ;;  %vm325_vm3 = vcmask 523264  }
  0x18   : > { %s624_s12 = sshll.u32 %s276_s9, 3  ;;  %s289_s15 = scalar_lea.vmem %s991_s1, %s276_s9  ;;  %vm380_vm4 = vcmask 785408   ;;  %v697_v23 = vld [vmem:[%s993_s3] ss:$0 sm:$0xff]  ;;  %v404_v25 = vshrl.u32 %v403_v22, 7 }
  0x19   : > { %s282_s24 = scalar_lea.vmem %s990_s0, %s624_s12  ;;  %v294_v2 = vld [vmem:[%s289_s15] sm:$0x1]  ;;  %s811_s9 = smov 64  }
  0x1a   : > { %v625_v3 = vld [vmem:[%s282_s24] sm:$0xff]  ;;  %v309_v4 = vshll.u32 %v294_v2, 16  ;;  %v318_v14 = vrot.slane %v294_v2, 1  ;;  %s587_s15 = sshll.u32 %s927_s14, 4  ;;  %s632_s24 = sshll.u32 %s800_s21, 4  ;;  %v405_v27 = vadd.s32 8, %v404_v25 }
  0x1b   : > { %386 = vmatpush.bf16.msra.mxu0 %v630_v1  ;;  %v302_v6 = vshrl.u32 %v625_v3, 16  ;;  %v304_v7 = vshll.u32 %v625_v3, 16  ;;  %v317_v13 = vrot.slane %v625_v3, 1  ;;  %s267_s25 = scalar_lea.vmem [#allocation2], %s587_s15  ;;  %s444_s7 = scalar_lea.hbm %s994_s4, %s632_s24 }
  0x1c   : > { %v311_v9 = vrot.slane %v309_v4, 1  ;;  %vm408_vm5 = vcmp.lt.s32.totalorder %v405_v27, 9 }
  0x1d   : > { %v306_v8 = vrot.slane %v304_v7, 1  ;;  %v319_v15 = vsel %vm316_vm1, %v317_v13, %v318_v14 }
  0x1f   : > { %387 = vmatpush.bf16.msra.mxu0 %v629_v5  ;;  %v307_v11 = vor.u32 %v306_v8, %v302_v6 }
  0x21   : > { %v312_v12 = vsel %vm300_vm0, %v307_v11, %v311_v9 }
  0x22   : > { %313 = vrot.lane.b32.xlu0 %v312_v12, %s810_s8  ;;  %s445_s8 = sshll.u32 %s267_s25, 4  ;;  %s446_s8 = int_to_ptr.vmem [resolvable:$true] %s445_s8 }
  0x23   : > { %388 = vmatpush.bf16.msra.mxu0 %v628_v10 }
  0x27   : > { %389 = vmatpush.bf16.msra.mxu0 %v627_v16 }
  0x2a   : > { %320 = vrot.lane.b32.xlu0 %v319_v15, %s811_s9  ;;  %s447_s9 = sshll.u32 %s444_s7, 4  ;;  %s448_s9 = int_to_ptr.hbm [resolvable:$true] %s447_s9 }
  0x2b   : > { %390 = vmatpush.bf16.msra.mxu0 %v626_v17  ;;  %s712_s11 = sshra.s32 %s448_s9, 4  ;;  %s713_s11 = int_to_ptr.hbm [resolvable:$true] %s712_s11 }
  0x2c   : > { %s714_s12 = scalar_lea.hbm %s713_s11, 16  ;;  %p719_p1 = scmp.lt.s32.totalorder %s713_s11, %s994_s4 }
  0x2d   : > { %p715_p12 = scmp.ne.s32.totalorder %s713_s11, %s714_s12  ;;  %p720_p2 = scmp.lt.s32.totalorder %s718_s16, %s714_s12 }
  0x2f   : > { %p716_p13 = pnand %p715_p12, %p884_p4  ;;  %p721_p3 = por %p720_p2, %p719_p1 }
  0x31   : > { %p717_p0 = pneg %p716_p13 }
  0x33   : > { %p722_p5 = pnand %p721_p3, %p717_p0 }
  0x94   : > { %v314_v18 = vpop.permute.xlu0 %313 }
  0x95   : > { %v324_v19 = vsel %vm322_vm2, %v625_v3, %v314_v18 }
  0x9c   : > { %v321_v20 = vpop.permute.xlu0 %320 }
  0x9d   : > { %v327_v21 = vsel %vm325_vm3, %v324_v19, %v321_v20 }
  0x9e   : > { %618 = vmatmul.msk.bf16.vlgmr.msra.gmra.mxu0 %vm380_vm4, %v327_v21 }
 0x11b   : > { %v392_v24 = vpop.f32.mrf.mxu0 }
 0x11c   : > { %v393_v26 = vadd.f32 %v697_v23, %v392_v24 }
 0x11e   : > { %397 = vst.msk [vmem:[%s267_s25] sm:$0xff] %vm322_vm2, %v393_v26  ;;  %v415_v31 = vsel %vm322_vm2, %v393_v26, 0.0 }
 0x123   : > { %v394_v28 = vpop.f32.mrf.mxu0 }
 0x124   : > { %v395_v29 = vadd.f32 %v697_v23, %v394_v28 }
 0x126   : > { %398 = vst.msk [vmem:[%s267_s25 + $0x8] sm:$0xff] %vm322_vm2, %v395_v29  ;;  %v414_v30 = vsel %vm408_vm5, %v395_v29, 0.0 }
 0x127   : > { %v416_v32 = vsel %vm322_vm2, %v414_v30, 0.0 }
 0x128   : > { %725 = shalt.err (!%p722_p5)
}
 0x129   : > { %s812_s25 = smov 128   ;;  %s813_s27 = smov 8   ;;  %v417_v33 = vadd.f32 %v416_v32, %v415_v31  ;;  %vm424_vm6 = vcmask 253952  }
 0x12a   : > { %633 = dma.vmem_to_hbm [thread:$0]  (%p884_p4), %s446_s8, 256, %s448_s9, %s427_s10, %s812_s25, %s812_s25, %s813_s27  }
 0x12b   : > { %v418_v34 = vrot.slane %v417_v33, 4  ;;  %s460_s11 = scalar_lea.hbm %s995_s5, %s800_s21  ;;  %s273_s12 = scalar_lea.vmem [#allocation4], %s927_s14 }
 0x12c   : > { %s462_s13 = sshll.u32 %s273_s12, 4  ;;  %s464_s15 = sshll.u32 %s460_s11, 4  ;;  %s463_s13 = int_to_ptr.vmem [resolvable:$true] %s462_s13  ;;  %s465_s15 = int_to_ptr.hbm [resolvable:$true] %s464_s15 }
 0x12d   : > { %v419_v35 = vadd.f32 %v418_v34, %v417_v33  ;;  %s432_s8 = scalar_lea.sflag [#allocation5], %s927_s14  ;;  %s740_s9 = sshra.s32 %s465_s15, 4  ;;  %s741_s9 = int_to_ptr.hbm [resolvable:$true] %s740_s9 }
 0x12e   : > { %s742_s10 = scalar_lea.hbm %s741_s9, 1  ;;  %s746_s17 = scalar_lea.hbm %s995_s5, 2 }
 0x12f   : > { %v420_v36 = vrot.slane %v419_v35, 2  ;;  %p743_p6 = scmp.ne.s32.totalorder %s741_s9, %s742_s10  ;;  %p747_p10 = scmp.lt.s32.totalorder %s741_s9, %s995_s5 }
 0x130   : > { %p748_p11 = scmp.lt.s32.totalorder %s746_s17, %s742_s10 }
 0x131   : > { %v421_v37 = vadd.f32 %v420_v36, %v419_v35  ;;  %p744_p7 = pnand %p743_p6, %p884_p4 }
 0x132   : > { %p749_p12 = por %p748_p11, %p747_p10 }
 0x133   : > { %v422_v38 = vrot.slane %v421_v37, 1  ;;  %p745_p9 = pneg %p744_p7 }
 0x135   : > { %v423_v39 = vadd.f32 %v422_v38, %v421_v37  ;;  %p750_p13 = pnand %p749_p12, %p745_p9 }
 0x137   : > { %425 = vst.msk [vmem:[%s273_s12] sm:$0x1] %vm424_vm6, %v423_v39 }
 0x138   : > { %753 = shalt.err (!%p750_p13)
}
 0x139   : > { %634 = dma.vmem_to_hbm [thread:$0]  (%p884_p4), %s463_s13, 16, %s465_s15, %s432_s8  }
 0x13a PF: > { %p644_p0 = scmp.ge.s32.totalorder %s808_s23, 2  ;;  %s476_s14 = sand.u32 1, %s788_s18  }
 0x13b   : > { %s477_s27 = scalar_lea.sflag [#allocation3], %s476_s14 }
 0x13c   : > { %p638_p1 = pnand %p644_p0, %p891_p8 }
 0x13e   : > { %p639_p2 = pneg %p638_p1 }
 0x140   : > { %779 = dma.done.wait (%p639_p2), %s477_s27, 256  }
 0x141   : > { %781 = vsyncadd (%p639_p2), %s477_s27, 4294967040  ;;  %s487_s29 = scalar_lea.sflag [#allocation5], %s476_s14 }
 0x142   : > { %783 = dma.done.wait (%p639_p2), %s487_s29, 16  }
 0x143   : > { %785 = vsyncadd (%p639_p2), %s487_s29, 4294967280  ;;  %s22_s23 = sadd.s32 1, %s808_s23   ;;  %s998_s18 = smov %s792_s19 }
 0x144   : > { %p19_p3 = scmp.ge.s32.totalorder %s22_s23, 4   ;;  %s999_s19 = smov %s796_s20 }
 0x145   : > { %s1000_s20 = smov %s897_s6  ;;  %s1001_s21 = smov %s804_s22 }
 0x146   : > { %s1002_s22 = smov %s1004_s26  ;;  %21 = sbr.rel (!%p19_p3) target bundleno = 6 (0x6), region = 91 }
 0x14b   :  { %492 = vsyncpa [#allocation3], 1 }
 0x14c   :  { %494 = vsyncpa [#allocation3 + $0x1], 1 }
 0x14d   :  { %495 = vsyncpa [#allocation5], 1 }
 0x14e   :  { %497 = vsyncpa [#allocation5 + $0x1], 1 }

</bundles_post_ra>
